<compile_context>
chip_gen: v6e
topology: v6e:2x2x1
jax: 0.10.0
libtpu: 0.0.40
codegen_flags: <defaults>
</compile_context>

<pallas_src>
import jax
import jax.numpy as jnp
from jax.experimental import pallas as pl
from jax.experimental.pallas import tpu as pltpu

# ---- module configuration (mirrors AdaptiveLogSoftmax.__init__) -------------
D_MODEL = 32
N_CLASSES = 20
CUTOFFS = [4, 10]                 # user cutoffs
BATCH = 16

_FULL_CUTOFFS = CUTOFFS + [N_CLASSES]             # self.cutoffs
_CUTOFF_VALUES = [0] + _FULL_CUTOFFS              # [0, c0, c1, n_classes]
SHORTLIST = _FULL_CUTOFFS[0]                      # self.shortlist_size
N_CLUSTERS = len(_FULL_CUTOFFS) - 1               # self.n_clusters
HEAD_SIZE = SHORTLIST + N_CLUSTERS                # self.head_size
CLUSTER_SIZES = [_FULL_CUTOFFS[i + 1] - _FULL_CUTOFFS[i] for i in range(N_CLUSTERS)]

# Fused output layout: [head(shortlist) | cluster slots | tail0 | tail1 | ...]
N_COLS = HEAD_SIZE + sum(CLUSTER_SIZES)           # == N_CLASSES + N_CLUSTERS

_SEG_WIDTHS = [HEAD_SIZE] + CLUSTER_SIZES
_SEGMENTS = []
_off = 0
for _w in _SEG_WIDTHS:
    _SEGMENTS.append((_off, _off + _w))
    _off += _w
assert _off == N_COLS

# Validity checks (the -inf segment masking needs every segment non-empty;
# degenerate cutoffs would give NaN normalizers).
assert CUTOFFS == sorted(CUTOFFS) and len(set(CUTOFFS)) == len(CUTOFFS)
assert min(CUTOFFS) > 0 and max(CUTOFFS) <= N_CLASSES - 1
assert all(w > 0 for w in _SEG_WIDTHS), "zero-width segment -> NaN log-softmax"
# Single-fused-matmul design assumes the whole fused vocab fits in VMEM.
assert N_COLS <= 1024, "use the vocab-tiled variant (see TODO) for large vocab"


# ---- kernel ------------------------------------------------------------------
def _asm_kernel(w_ref, x_ref, tgt_ref, out_ref):
    # Single fused MXU pass (bias is the last K column of W / ones row of x^T);
    # f32 accumulation regardless of input dtype.
    logits = jnp.dot(w_ref[...], x_ref[...],
                     preferred_element_type=jnp.float32)     # (N_COLS, TB) f32
    tgt = tgt_ref[...]                                        # (1, TB) int32

    row = jax.lax.broadcasted_iota(jnp.int32, logits.shape, 0)

    # --- segmented log-softmax normalizers, single exp pass --------------------
    seg_masks, seg_maxes = [], []
    maxvec = jnp.zeros_like(logits)
    for lo, hi in _SEGMENTS:                                  # static, 1+N_CLUSTERS
        seg = (row >= lo) & (row < hi)
        m = jnp.max(jnp.where(seg, logits, -jnp.inf), axis=0, keepdims=True)
        maxvec = jnp.where(seg, m, maxvec)
        seg_masks.append(seg)
        seg_maxes.append(m)

    e = jnp.exp(logits - maxvec)                              # ONE EUP pass

    norm = jnp.zeros_like(logits)
    for seg, m in zip(seg_masks, seg_maxes):
        s = jnp.sum(jnp.where(seg, e, 0.0), axis=0, keepdims=True)   # (1, TB)
        norm = jnp.where(seg, m + jnp.log(s), norm)
    lp = logits - norm                                        # fused log-probs

    # --- fused head + tail gather ----------------------------------------------
    # Bucket of each target: 0 = shortlist, i>=1 = tail cluster i-1.
    bucket = jnp.zeros_like(tgt)
    for c in _FULL_CUTOFFS[:-1]:                              # static python loop
        bucket = bucket + (tgt >= c).astype(jnp.int32)

    # Head row: target itself (shortlist) or its cluster slot.
    head_row = jnp.where(bucket == 0, tgt, SHORTLIST + bucket - 1)
    # Tail row: in the fused layout class t (>= SHORTLIST) lives at row
    # t + N_CLUSTERS.  Only active for bucket >= 1 (masked below).
    tail_row = tgt + N_CLUSTERS

    gmask = (row == head_row) | ((row == tail_row) & (bucket >= 1))
    # Lane-dense (1, TB) result -> full-width vector stores on writeback.
    out_ref[...] = jnp.sum(jnp.where(gmask, lp, 0.0), axis=0, keepdims=True)


# ---- wrapper -----------------------------------------------------------------
def _pick_row_tile(batch):
    # Each grid step carries ~0.35 us fixed overhead: never split tiny batches.
    if batch <= 512:
        return batch                      # grid=(1,) at toy / small sizes
    # Realistic batches: 512-lane tiles (multiple of 128 for v5e MXU / lane
    # alignment); grid >= 2 keeps both v7x TensorCores busy with >=1 step each.
    return 512


@jax.jit
def adaptive_log_softmax_forward(x, target, fused_wt_aug):
    batch, d_model = x.shape
    row_tile = _pick_row_tile(batch)
    padded = ((batch + row_tile - 1) // row_tile) * row_tile
    if padded != batch:                   # static (shape-derived) branch
        x = jnp.pad(x, ((0, padded - batch), (0, 0)))
        target = jnp.pad(target, (0, padded - batch))   # class 0 is always valid

    # Layout plumbing (outside the kernel): batch -> lanes, bias -> extra K row.
    xt_aug = jnp.concatenate([x.T, jnp.ones((1, padded), x.dtype)], axis=0)
    tgt2d = target.reshape(1, padded).astype(jnp.int32)

    out = pl.pallas_call(
        _asm_kernel,
        out_shape=jax.ShapeDtypeStruct((1, padded), jnp.float32),
        grid_spec=pltpu.PrefetchScalarGridSpec(
            num_scalar_prefetch=0,
            grid=(padded // row_tile,),
            in_specs=[
                # Invariant fused weights (bias folded in); constant index_map,
                # kept resident across grid steps.
                pl.BlockSpec((N_COLS, D_MODEL + 1), lambda i: (0, 0)),
                pl.BlockSpec((D_MODEL + 1, row_tile), lambda i: (0, i)),   # x^T
                pl.BlockSpec((1, row_tile), lambda i: (0, i)),             # targets
            ],
            out_specs=pl.BlockSpec((1, row_tile), lambda i: (0, i)),
        ),
        compiler_params=pltpu.CompilerParams(
            dimension_semantics=("parallel",)),
    )(fused_wt_aug, xt_aug, tgt2d)

    out = out.reshape(padded)[:batch]
    loss = jnp.mean(-out)          # tiny (B,) reduction; keeps batch axis parallel
    return out, loss


# ---- pure-JAX reference (mirrors the PyTorch forward) --------------------------
def reference_forward(x, target, head_w, head_b, clus_w, clus_b, tail_ws, tail_bs):
    b = target.shape[0]
    head_full = jnp.concatenate([x @ head_w + head_b, x @ clus_w + clus_b], axis=1)
    head_lp = jax.nn.log_softmax(head_full, axis=-1)
    bucket = jnp.zeros_like(target)
    for c in _FULL_CUTOFFS[:-1]:
        bucket = bucket + (target >= c).astype(jnp.int32)
    gather_ind = jnp.where(bucket == 0, target, SHORTLIST + bucket - 1)
    out = head_lp[jnp.arange(b), gather_ind]
    for ci in range(N_CLUSTERS):
        lo = _CUTOFF_VALUES[ci + 1]
        lp = jax.nn.log_softmax(x @ tail_ws[ci] + tail_bs[ci], axis=-1)
        rel = jnp.clip(target - lo, 0, CLUSTER_SIZES[ci] - 1)
        g = lp[jnp.arange(b), rel]
        out = out + jnp.where(bucket == ci + 1, g, 0.0)
    return out, jnp.mean(-out)


# ---- parameter construction ----------------------------------------------------
def make_params(key):
    def linear_init(key, fan_in, fan_out):
        kw, kb = jax.random.split(key)
        bound = 1.0 / jnp.sqrt(fan_in)
        w = jax.random.uniform(kw, (fan_in, fan_out), jnp.float32, -bound, bound)
        b = jax.random.uniform(kb, (fan_out,), jnp.float32, -bound, bound)
        return w, b

    keys = jax.random.split(key, 2 + N_CLUSTERS)
    head_w, head_b = linear_init(keys[0], D_MODEL, SHORTLIST)      # self.head
    clus_w, clus_b = linear_init(keys[1], D_MODEL, N_CLUSTERS)     # self.cluster
    tail_ws, tail_bs = [], []
    for i in range(N_CLUSTERS):                                    # self.tail[i]
        w, b = linear_init(keys[2 + i], D_MODEL, CLUSTER_SIZES[i])
        tail_ws.append(w)
        tail_bs.append(b)

    # Pack everything contiguously along the output axis, transpose for the
    # lane-dense kernel layout, and fold the bias in as the last K column.
    fused_w = jnp.concatenate([head_w, clus_w] + tail_ws, axis=1)      # (D, N_COLS)
    fused_b = jnp.concatenate([head_b, clus_b] + tail_bs, axis=0)      # (N_COLS,)
    fused_wt_aug = jnp.concatenate([fused_w.T, fused_b[:, None]], axis=1)  # (N_COLS, D+1)
    return head_w, head_b, clus_w, clus_b, tail_ws, tail_bs, fused_wt_aug


if __name__ == "__main__":
    key = jax.random.PRNGKey(0)
    k_param, k_x, k_t = jax.random.split(key, 3)

    (head_w, head_b, clus_w, clus_b, tail_ws, tail_bs,
     fused_wt_aug) = make_params(k_param)

    x = jax.random.normal(k_x, (BATCH, D_MODEL), jnp.float32)
    target = jax.random.randint(k_t, (BATCH,), 0, N_CLASSES, dtype=jnp.int32)

    out, loss = adaptive_log_softmax_forward(x, target, fused_wt_aug)
    out = jax.block_until_ready(out)
    loss = jax.block_until_ready(loss)

    ref_out, ref_loss = reference_forward(
        x, target, head_w, head_b, clus_w, clus_b, tail_ws, tail_bs)

    assert jnp.allclose(out, ref_out, rtol=1e-5, atol=1e-4), (out, ref_out)
    assert jnp.allclose(loss, ref_loss, rtol=1e-5, atol=1e-4), (loss, ref_loss)

    print("KERNEL_OK")
</pallas_src>

<mosaic_0001>
module attributes {stable_mosaic.version = 11 : i64} {
  func.func @_asm_kernel(%arg0: i32, %arg1: memref<22x33xf32, #tpu.memory_space<vmem>>, %arg2: memref<33x16xf32, #tpu.memory_space<vmem>>, %arg3: memref<1x16xi32, #tpu.memory_space<vmem>>, %arg4: memref<1x16xf32, #tpu.memory_space<vmem>>) attributes {dimension_semantics = [#tpu.dimension_semantics<parallel>], iteration_bounds = array<i64: 1>, scalar_prefetch = 0 : i64, scratch_operands = 0 : i64, tpu.core_type = #tpu.core_type<tc>, window_params = [{pipeline_mode = #tpu.pipeline_mode<synchronous>, transform_indices = @transform_0, window_bounds = array<i64: 22, 33>}, {transform_indices = @transform_1, window_bounds = array<i64: 33, 16>}, {transform_indices = @transform_2, window_bounds = array<i64: 1, 16>}, {transform_indices = @transform_3, window_bounds = array<i64: 1, 16>}]} {
    %c0 = arith.constant 0 : index
    %c0_0 = arith.constant 0 : index
    %0 = vector.load %arg1[%c0, %c0_0] : memref<22x33xf32, #tpu.memory_space<vmem>>, vector<22x33xf32>
    %c0_1 = arith.constant 0 : index
    %c0_2 = arith.constant 0 : index
    %1 = vector.load %arg2[%c0_1, %c0_2] : memref<33x16xf32, #tpu.memory_space<vmem>>, vector<33x16xf32>
    %cst = arith.constant dense<0.000000e+00> : vector<22x16xf32>
    %2 = tpu.matmul %0, %1, %cst {dimension_numbers = #tpu.dot_dimension_numbers<[1], [0], [0], [1], [0, 0, 1, 1], [], []>} : vector<22x33xf32>, vector<33x16xf32>, vector<22x16xf32> -> vector<22x16xf32>
    %c0_3 = arith.constant 0 : index
    %c0_4 = arith.constant 0 : index
    %3 = vector.load %arg3[%c0_3, %c0_4] : memref<1x16xi32, #tpu.memory_space<vmem>>, vector<1x16xi32>
    %4 = tpu.iota {dimensions = array<i32: 0>} : vector<22x16xi32>
    %cst_5 = arith.constant 0.000000e+00 : f32
    %5 = vector.broadcast %cst_5 : f32 to vector<22x16xf32>
    %c0_i32 = arith.constant 0 : i32
    %6 = vector.broadcast %c0_i32 : i32 to vector<22x16xi32>
    %7 = arith.cmpi sge, %4, %6 : vector<22x16xi32>
    %c6_i32 = arith.constant 6 : i32
    %8 = vector.broadcast %c6_i32 : i32 to vector<22x16xi32>
    %9 = arith.cmpi slt, %4, %8 : vector<22x16xi32>
    %10 = arith.andi %7, %9 : vector<22x16xi1>
    %cst_6 = arith.constant 0xFF800000 : f32
    %11 = vector.broadcast %cst_6 : f32 to vector<22x16xf32>
    %12 = arith.select %10, %2, %11 : vector<22x16xi1>, vector<22x16xf32>
    %cst_7 = arith.constant dense<0xFF800000> : vector<16xf32>
    %13 = vector.multi_reduction <maximumf>, %12, %cst_7 [0] : vector<22x16xf32> to vector<16xf32>
    %14 = vector.shape_cast %13 : vector<16xf32> to vector<1x16xf32>
    %15 = vector.shape_cast %14 : vector<1x16xf32> to vector<1x16xf32>
    %16 = vector.broadcast %15 : vector<1x16xf32> to vector<22x16xf32>
    %17 = arith.select %10, %16, %5 : vector<22x16xi1>, vector<22x16xf32>
    %c6_i32_8 = arith.constant 6 : i32
    %18 = vector.broadcast %c6_i32_8 : i32 to vector<22x16xi32>
    %19 = arith.cmpi sge, %4, %18 : vector<22x16xi32>
    %c12_i32 = arith.constant 12 : i32
    %20 = vector.broadcast %c12_i32 : i32 to vector<22x16xi32>
    %21 = arith.cmpi slt, %4, %20 : vector<22x16xi32>
    %22 = arith.andi %19, %21 : vector<22x16xi1>
    %cst_9 = arith.constant 0xFF800000 : f32
    %23 = vector.broadcast %cst_9 : f32 to vector<22x16xf32>
    %24 = arith.select %22, %2, %23 : vector<22x16xi1>, vector<22x16xf32>
    %cst_10 = arith.constant dense<0xFF800000> : vector<16xf32>
    %25 = vector.multi_reduction <maximumf>, %24, %cst_10 [0] : vector<22x16xf32> to vector<16xf32>
    %26 = vector.shape_cast %25 : vector<16xf32> to vector<1x16xf32>
    %27 = vector.shape_cast %26 : vector<1x16xf32> to vector<1x16xf32>
    %28 = vector.broadcast %27 : vector<1x16xf32> to vector<22x16xf32>
    %29 = arith.select %22, %28, %17 : vector<22x16xi1>, vector<22x16xf32>
    %c12_i32_11 = arith.constant 12 : i32
    %30 = vector.broadcast %c12_i32_11 : i32 to vector<22x16xi32>
    %31 = arith.cmpi sge, %4, %30 : vector<22x16xi32>
    %c22_i32 = arith.constant 22 : i32
    %32 = vector.broadcast %c22_i32 : i32 to vector<22x16xi32>
    %33 = arith.cmpi slt, %4, %32 : vector<22x16xi32>
    %34 = arith.andi %31, %33 : vector<22x16xi1>
    %cst_12 = arith.constant 0xFF800000 : f32
    %35 = vector.broadcast %cst_12 : f32 to vector<22x16xf32>
    %36 = arith.select %34, %2, %35 : vector<22x16xi1>, vector<22x16xf32>
    %cst_13 = arith.constant dense<0xFF800000> : vector<16xf32>
    %37 = vector.multi_reduction <maximumf>, %36, %cst_13 [0] : vector<22x16xf32> to vector<16xf32>
    %38 = vector.shape_cast %37 : vector<16xf32> to vector<1x16xf32>
    %39 = vector.shape_cast %38 : vector<1x16xf32> to vector<1x16xf32>
    %40 = vector.broadcast %39 : vector<1x16xf32> to vector<22x16xf32>
    %41 = arith.select %34, %40, %29 : vector<22x16xi1>, vector<22x16xf32>
    %42 = arith.subf %2, %41 : vector<22x16xf32>
    %43 = math.exp %42 : vector<22x16xf32>
    %cst_14 = arith.constant 0.000000e+00 : f32
    %44 = vector.broadcast %cst_14 : f32 to vector<22x16xf32>
    %cst_15 = arith.constant 0.000000e+00 : f32
    %45 = vector.broadcast %cst_15 : f32 to vector<22x16xf32>
    %46 = arith.select %10, %43, %45 : vector<22x16xi1>, vector<22x16xf32>
    %cst_16 = arith.constant dense<0.000000e+00> : vector<16xf32>
    %47 = vector.multi_reduction <add>, %46, %cst_16 [0] : vector<22x16xf32> to vector<16xf32>
    %48 = vector.shape_cast %47 : vector<16xf32> to vector<1x16xf32>
    %49 = math.log %48 : vector<1x16xf32>
    %50 = arith.addf %14, %49 : vector<1x16xf32>
    %51 = vector.shape_cast %50 : vector<1x16xf32> to vector<1x16xf32>
    %52 = vector.broadcast %51 : vector<1x16xf32> to vector<22x16xf32>
    %53 = arith.select %10, %52, %44 : vector<22x16xi1>, vector<22x16xf32>
    %cst_17 = arith.constant 0.000000e+00 : f32
    %54 = vector.broadcast %cst_17 : f32 to vector<22x16xf32>
    %55 = arith.select %22, %43, %54 : vector<22x16xi1>, vector<22x16xf32>
    %cst_18 = arith.constant dense<0.000000e+00> : vector<16xf32>
    %56 = vector.multi_reduction <add>, %55, %cst_18 [0] : vector<22x16xf32> to vector<16xf32>
    %57 = vector.shape_cast %56 : vector<16xf32> to vector<1x16xf32>
    %58 = math.log %57 : vector<1x16xf32>
    %59 = arith.addf %26, %58 : vector<1x16xf32>
    %60 = vector.shape_cast %59 : vector<1x16xf32> to vector<1x16xf32>
    %61 = vector.broadcast %60 : vector<1x16xf32> to vector<22x16xf32>
    %62 = arith.select %22, %61, %53 : vector<22x16xi1>, vector<22x16xf32>
    %cst_19 = arith.constant 0.000000e+00 : f32
    %63 = vector.broadcast %cst_19 : f32 to vector<22x16xf32>
    %64 = arith.select %34, %43, %63 : vector<22x16xi1>, vector<22x16xf32>
    %cst_20 = arith.constant dense<0.000000e+00> : vector<16xf32>
    %65 = vector.multi_reduction <add>, %64, %cst_20 [0] : vector<22x16xf32> to vector<16xf32>
    %66 = vector.shape_cast %65 : vector<16xf32> to vector<1x16xf32>
    %67 = math.log %66 : vector<1x16xf32>
    %68 = arith.addf %38, %67 : vector<1x16xf32>
    %69 = vector.shape_cast %68 : vector<1x16xf32> to vector<1x16xf32>
    %70 = vector.broadcast %69 : vector<1x16xf32> to vector<22x16xf32>
    %71 = arith.select %34, %70, %62 : vector<22x16xi1>, vector<22x16xf32>
    %72 = arith.subf %2, %71 : vector<22x16xf32>
    %c0_i32_21 = arith.constant 0 : i32
    %73 = vector.broadcast %c0_i32_21 : i32 to vector<1x16xi32>
    %c4_i32 = arith.constant 4 : i32
    %74 = vector.broadcast %c4_i32 : i32 to vector<1x16xi32>
    %75 = arith.cmpi sge, %3, %74 : vector<1x16xi32>
    %76 = arith.extui %75 : vector<1x16xi1> to vector<1x16xi32>
    %77 = arith.addi %73, %76 : vector<1x16xi32>
    %c10_i32 = arith.constant 10 : i32
    %78 = vector.broadcast %c10_i32 : i32 to vector<1x16xi32>
    %79 = arith.cmpi sge, %3, %78 : vector<1x16xi32>
    %80 = arith.extui %79 : vector<1x16xi1> to vector<1x16xi32>
    %81 = arith.addi %77, %80 : vector<1x16xi32>
    %c0_i32_22 = arith.constant 0 : i32
    %82 = vector.broadcast %c0_i32_22 : i32 to vector<1x16xi32>
    %83 = arith.cmpi eq, %81, %82 : vector<1x16xi32>
    %c4_i32_23 = arith.constant 4 : i32
    %84 = vector.broadcast %c4_i32_23 : i32 to vector<1x16xi32>
    %85 = arith.addi %84, %81 : vector<1x16xi32>
    %c1_i32 = arith.constant 1 : i32
    %86 = vector.broadcast %c1_i32 : i32 to vector<1x16xi32>
    %87 = arith.subi %85, %86 : vector<1x16xi32>
    %88 = arith.select %83, %3, %87 : vector<1x16xi1>, vector<1x16xi32>
    %c2_i32 = arith.constant 2 : i32
    %89 = vector.broadcast %c2_i32 : i32 to vector<1x16xi32>
    %90 = arith.addi %3, %89 : vector<1x16xi32>
    %91 = vector.broadcast %88 : vector<1x16xi32> to vector<22x16xi32>
    %92 = arith.cmpi eq, %4, %91 : vector<22x16xi32>
    %93 = vector.broadcast %90 : vector<1x16xi32> to vector<22x16xi32>
    %94 = arith.cmpi eq, %4, %93 : vector<22x16xi32>
    %c1_i32_24 = arith.constant 1 : i32
    %95 = vector.broadcast %c1_i32_24 : i32 to vector<1x16xi32>
    %96 = arith.cmpi sge, %81, %95 : vector<1x16xi32>
    %97 = vector.broadcast %96 : vector<1x16xi1> to vector<22x16xi1>
    %98 = arith.andi %94, %97 : vector<22x16xi1>
    %99 = arith.ori %92, %98 : vector<22x16xi1>
    %cst_25 = arith.constant 0.000000e+00 : f32
    %100 = vector.broadcast %cst_25 : f32 to vector<22x16xf32>
    %101 = arith.select %99, %72, %100 : vector<22x16xi1>, vector<22x16xf32>
    %cst_26 = arith.constant dense<0.000000e+00> : vector<16xf32>
    %102 = vector.multi_reduction <add>, %101, %cst_26 [0] : vector<22x16xf32> to vector<16xf32>
    %103 = vector.shape_cast %102 : vector<16xf32> to vector<1x16xf32>
    %c0_27 = arith.constant 0 : index
    %c0_28 = arith.constant 0 : index
    %104 = vector.load %arg4[%c0_27, %c0_28] : memref<1x16xf32, #tpu.memory_space<vmem>>, vector<1x16xf32>
    tpu.vector_store %arg4[%c0_27, %c0_28], %103 {strides = array<i32>} : memref<1x16xf32, #tpu.memory_space<vmem>>, vector<1x16xf32>,
    return
  }
  func.func @transform_0(%arg0: i32) -> (i32, i32) {
    %c0_i32 = arith.constant 0 : i32
    %c0_i32_0 = arith.constant 0 : i32
    %c0_i32_1 = arith.constant 0 : i32
    return %c0_i32, %c0_i32_0 : i32, i32
  }
  func.func @transform_1(%arg0: i32) -> (i32, i32) {
    %c0_i32 = arith.constant 0 : i32
    %c0_i32_0 = arith.constant 0 : i32
    return %c0_i32, %arg0 : i32, i32
  }
  func.func @transform_2(%arg0: i32) -> (i32, i32) {
    %c0_i32 = arith.constant 0 : i32
    %c0_i32_0 = arith.constant 0 : i32
    return %c0_i32, %arg0 : i32, i32
  }
  func.func @transform_3(%arg0: i32) -> (i32, i32) {
    %c0_i32 = arith.constant 0 : i32
    %c0_i32_0 = arith.constant 0 : i32
    return %c0_i32, %arg0 : i32, i32
  }
}

</mosaic_0001>

<bundles_post_ra>
// kernel: adaptive_log_softmax_forward.1
= control target key start
LH: loop header
LB: loop body
LE: loop exit
PB: predicated region body
PF: predicated region fallthrough
CT: control target
= control target key end

     0   :  { %vm32_vm0 = vcmask 1040384   ;;  %v387_v0 = vmov 0.0   ;;  %vm22_vm1 = vcmask 269312   ;;  %vm388_vm2 = vmmov 0   ;;  %s544_s1 = inlined_call_operand.vmem [shape: f32[33,16], index: 1, kind: input, shape index: {}]   ;;  %s545_s0 = inlined_call_operand.vmem [shape: f32[22,33], index: 0, kind: input, shape index: {}]   ;;  %s546_s2 = inlined_call_operand.vmem [shape: s32[1,16], index: 2, kind: input, shape index: {}]   ;;  %s547_s3 = inlined_call_operand.vmem [shape: f32[1,16], index: 3, kind: output, shape index: {}]  }
   0x1   :  { %343 = vmatprep.subr.mxu0 %v387_v0  ;;  %362 = vmatprep.subr.mxu1 %v387_v0  ;;  %v21_v1 = vld [vmem:[%s544_s1 + $0x20] sm:$0x1]  ;;  %v20_v2 = vld [vmem:[%s544_s1 + $0x18] sm:$0xff]  ;;  %v19_v3 = vld [vmem:[%s544_s1 + $0x10] sm:$0xff]  ;;  %v117_v9 = vlaneseq  ;;  %vm549_vm6 = vcmask 130048   ;;  %vm548_vm9 = vcmask 128000  }
   0x2   :  { %344 = vmatpush3.msk.msra.mxu0 %vm32_vm0, %v21_v1  ;;  %367 = vmatpush3.msk.msra.mxu1 %vm32_vm0, %v21_v1  ;;  %v18_v4 = vld [vmem:[%s544_s1 + $0x8] sm:$0xff]  ;;  %v17_v5 = vld [vmem:[%s544_s1] sm:$0xff]  ;;  %v16_v8 = vld [vmem:[%s545_s0 + $0x10] sm:$0x3f] }
   0x3   :  { %345 = vmatprep.subr.mxu0 %v387_v0  ;;  %363 = vmatprep.subr.mxu1 %v387_v0  ;;  %v14_v6 = vld [vmem:[%s545_s0] sm:$0xff]  ;;  %v15_v7 = vld [vmem:[%s545_s0 + $0x8] sm:$0xff]  ;;  %v434_v10 = vshrl.u32 %v117_v9, 7 }
   0x4   :  { %346 = vmatpush3.msra.mxu0 %v20_v2  ;;  %368 = vmatpush3.msra.mxu1 %v20_v2 }
   0x5   :  { %347 = vmatprep.subr.mxu0 %v387_v0  ;;  %364 = vmatprep.subr.mxu1 %v387_v0  ;;  %v437_v11 = vadd.s32 8, %v434_v10  ;;  %vm124_vm3 = vcmp.lt.s32.totalorder %v434_v10, 6  ;;  %vm149_vm4 = vcmp.ge.s32.totalorder %v434_v10, 6  ;;  %v443_v12 = vadd.s32 16, %v434_v10 }
   0x6   :  { %348 = vmatpush3.msra.mxu0 %v19_v3  ;;  %369 = vmatpush3.msra.mxu1 %v19_v3 }
   0x7   :  { %349 = vmatprep.subr.mxu0 %v387_v0  ;;  %365 = vmatprep.subr.mxu1 %v387_v0  ;;  %vm153_vm5 = vcmp.lt.s32.totalorder %v437_v11, 12  ;;  %vm176_vm7 = vcmp.ge.s32.totalorder %v437_v11, 12  ;;  %vm180_vm8 = vcmp.lt.s32.totalorder %v443_v12, 22 }
   0x8   :  { %350 = vmatpush3.msra.mxu0 %v18_v4  ;;  %370 = vmatpush3.msra.mxu1 %v18_v4 }
   0x9   :  { %351 = vmatprep.subr.mxu0 %v387_v0  ;;  %366 = vmatprep.subr.mxu1 %v387_v0 }
   0xa   :  { %352 = vmatpush3.msra.mxu0 %v17_v5  ;;  %371 = vmatpush3.msra.mxu1 %v17_v5 }
   0xb   :  { %353 = vmatprep.mubr.msk.f32.mxu0 %vm388_vm2, %v387_v0  ;;  %356 = vmatprep.mubr.msk.f32.mxu1 %vm388_vm2, %v387_v0 }
   0xc   :  { %354 = vmatmul.mubr.msk.f32.vlgmr.msra.gmra.mxu0 %vm22_vm1, %v14_v6  ;;  %357 = vmatmul.mubr.msk.f32.vlgmr.msra.gmra.mxu1 %vm22_vm1, %v15_v7 }
   0xd   :  { %359 = vmatprep.mubr.msk.f32.mxu1 %vm388_vm2, %v387_v0 }
  0x10   :  { %360 = vmatmul.mubr.msk.f32.gmra.mxu1 %vm22_vm1, %v16_v8 }
  0xcc   :  { %v445_v13 = vpop.f32.mrf.mxu0  ;;  %v447_v14 = vpop.f32.mrf.mxu1 }
  0xcd   :  { %v130_v15 = vsel %vm124_vm3, %v445_v13, -inf  ;;  %v158_v16 = vsel %vm149_vm4, %v445_v13, -inf  ;;  %v159_v17 = vsel %vm153_vm5, %v447_v14, -inf  ;;  %v185_v25 = vsel %vm176_vm7, %v447_v14, -inf }
  0xce   :  { %v134_v18 = vsel %vm549_vm6, %v130_v15, -inf  ;;  %v161_v19 = vsel %vm549_vm6, %v158_v16, -inf  ;;  %v162_v20 = vsel %vm549_vm6, %v159_v17, -inf  ;;  %v358_v21 = vpop.f32.mrf.mxu1  ;;  %v355_v22 = vpop.f32.mrf.mxu0  ;;  %v188_v30 = vsel %vm549_vm6, %v185_v25, -inf  ;;  %v116_v15 = vld [vmem:[%s546_s2] sm:$0x1] }
  0xcf   :  { %v140_v23 = vrot.slane %v134_v18, 4  ;;  %v164_v24 = vmax.f32 %v161_v19, %v162_v20  ;;  %vm273_vm10 = vcmp.ge.s32.totalorder %v116_v15, 4  ;;  %vm275_vm11 = vcmp.ge.s32.totalorder %v116_v15, 10 }
  0xd0   :  { %v466_v26 = vpop.f32.mrf.mxu1 }
  0xd1   :  { %v141_v27 = vmax.f32 %v134_v18, %v140_v23  ;;  %v166_v28 = vrot.slane %v164_v24, 4  ;;  %v186_v29 = vsel %vm180_vm8, %v466_v26, -inf }
  0xd2   :  { %v189_v31 = vsel %vm548_vm9, %v186_v29, -inf  ;;  %v361_v32 = vpop.f32.mrf.mxu1  ;;  %v389_v29 = vmov 0  }
  0xd3   :  { %v142_v33 = vrot.slane %v141_v27, 2  ;;  %v167_v34 = vmax.f32 %v164_v24, %v166_v28  ;;  %v191_v35 = vmax.f32 %v188_v30, %v189_v31  ;;  %v274_v30 = vsel %vm273_vm10, 1, %v389_v29 }
  0xd4   :  { %v276_v31 = vsel %vm275_vm11, 1, %v389_v29 }
  0xd5   :  { %v143_v36 = vmax.f32 %v141_v27, %v142_v33  ;;  %v168_v37 = vrot.slane %v167_v34, 2  ;;  %v192_v38 = vrot.slane %v191_v35, 4 }
  0xd7   :  { %v144_v39 = vrot.slane %v143_v36, 1  ;;  %v169_v40 = vmax.f32 %v167_v34, %v168_v37  ;;  %v193_v41 = vmax.f32 %v191_v35, %v192_v38  ;;  %v277_v35 = vadd.s32 %v276_v31, %v274_v30 }
  0xd9   :  { %v473_v42 = vmax.f32 %v143_v36, %v144_v39  ;;  %v170_v43 = vrot.slane %v169_v40, 1  ;;  %v194_v44 = vrot.slane %v193_v41, 2  ;;  %vm297_vm12 = vcmp.ge.s32.totalorder %v277_v35, 1 }
  0xda   :  { %vm278_vm13 = vcmp.eq.s32.totalorder %v277_v35, 0 }
  0xdb   :  { %v146_v45 = vsel %vm124_vm3, %v473_v42, 0.0  ;;  %v478_v46 = vmax.f32 %v169_v40, %v170_v43  ;;  %v195_v47 = vmax.f32 %v193_v41, %v194_v44  ;;  %v279_v40 = vadd.s32 4, %v277_v35 }
  0xdc   :  { %v282_v43 = vadd.s32 2, %v116_v15  ;;  %v285_v44 = vsub.s32 0, %v434_v10 }
  0xdd   :  { %v172_v48 = vsel %vm149_vm4, %v478_v46, %v146_v45  ;;  %v196_v49 = vrot.slane %v195_v47, 1  ;;  %v173_v52 = vsel %vm153_vm5, %v478_v46, 0.0  ;;  %v334_v41 = vadd.s32 4294967295, %v279_v40 }
  0xde   :  { %v201_v50 = vsub.f32 %v445_v13, %v172_v48  ;;  %v298_v45 = vsel %vm297_vm12, 1, %v389_v29 }
  0xdf   :  { %v484_v51 = vmax.f32 %v195_v47, %v196_v49  ;;  %v281_v48 = vsel %vm278_vm13, %v116_v15, %v334_v41  ;;  %v293_v49 = vrot.slane %v282_v43, %v285_v44 }
  0xe0   :  { %v204_v53 = vmul.f32 1.442695, %v201_v50  ;;  %v302_v50 = vrot.slane %v298_v45, %v285_v44 }
  0xe1   :  { %v199_v54 = vsel %vm176_vm7, %v484_v51, %v173_v52  ;;  %v200_v55 = vsel %vm180_vm8, %v484_v51, 0.0  ;;  %vm294_vm14 = vcmp.eq.s32.totalorder %v434_v10, %v293_v49  ;;  %vm295_vm0 = vcmp.eq.s32.totalorder %v437_v11, %v293_v49 }
  0xe2   :  { %375 = vpow2.f32 %v204_v53  ;;  %v202_v56 = vsub.f32 %v447_v14, %v199_v54  ;;  %v203_v57 = vsub.f32 %v466_v26, %v200_v55  ;;  %v286_v53 = vrot.slane %v281_v48, %v285_v44 }
  0xe3   :  { %vm303_vm15 = vcmp.eq.s32.totalorder %v302_v50, 1  ;;  %vm296_vm1 = vcmp.eq.s32.totalorder %v443_v12, %v293_v49 }
  0xe4   :  { %v206_v58 = vmul.f32 1.442695, %v202_v56  ;;  %v208_v59 = vmul.f32 1.442695, %v203_v57  ;;  %vm287_vm2 = vcmp.eq.s32.totalorder %v434_v10, %v286_v53  ;;  %vm304_vm10 = vmand %vm294_vm14, %vm303_vm15  ;;  %vm288_vm11 = vcmp.eq.s32.totalorder %v437_v11, %v286_v53 }
  0xe5   :  { %vm305_vm12 = vmand %vm295_vm0, %vm303_vm15  ;;  %vm289_vm13 = vcmp.eq.s32.totalorder %v443_v12, %v286_v53 }
  0xe6   :  { %377 = vpow2.f32 %v206_v58  ;;  %vm308_vm14 = vmor %vm288_vm11, %vm305_vm12 }
  0xe7   :  { %379 = vpow2.f32 %v208_v59 }
  0xef   :  { %v376_v60 = vpop.eup %375 }
  0xf0   :  { %v210_v61 = vsel %vm124_vm3, %v376_v60, 0.0  ;;  %v230_v0 = vsel %vm149_vm4, %v376_v60, 0.0 }
  0xf1   :  { %v213_v62 = vsel %vm549_vm6, %v210_v61, 0.0  ;;  %v233_v6 = vsel %vm549_vm6, %v230_v0, 0.0 }
  0xf2   :  { %v218_v63 = vrot.slane %v213_v62, 4 }
  0xf3   :  { %v378_v1 = vpop.eup %377 }
  0xf4   :  { %v380_v2 = vpop.eup %379  ;;  %v219_v3 = vadd.f32 %v218_v63, %v213_v62  ;;  %v231_v4 = vsel %vm153_vm5, %v378_v1, 0.0  ;;  %v251_v5 = vsel %vm176_vm7, %v378_v1, 0.0 }
  0xf5   :  { %v234_v7 = vsel %vm549_vm6, %v231_v4, 0.0  ;;  %v252_v8 = vsel %vm180_vm8, %v380_v2, 0.0  ;;  %v254_v9 = vsel %vm549_vm6, %v251_v5, 0.0  ;;  %vm307_vm6 = vmor %vm287_vm2, %vm304_vm10 }
  0xf6   :  { %v220_v16 = vrot.slane %v219_v3, 2  ;;  %v235_v17 = vadd.f32 %v234_v7, %v233_v6  ;;  %v256_v18 = vsel %vm548_vm9, %v252_v8, 0.0  ;;  %vm306_vm9 = vmand %vm296_vm1, %vm303_vm15 }
  0xf7   :  { %v257_v19 = vadd.f32 %v256_v18, %v254_v9  ;;  %vm309_vm15 = vmor %vm289_vm13, %vm306_vm9 }
  0xf8   :  { %v221_v20 = vadd.f32 %v220_v16, %v219_v3  ;;  %v238_v21 = vrot.slane %v235_v17, 4 }
  0xf9   :  { %v258_v22 = vrot.slane %v257_v19, 4 }
  0xfa   :  { %v222_v23 = vrot.slane %v221_v20, 1  ;;  %v239_v24 = vadd.f32 %v238_v21, %v235_v17 }
  0xfb   :  { %v259_v25 = vadd.f32 %v258_v22, %v257_v19 }
  0xfc   :  { %v223_v27 = vadd.f32 %v222_v23, %v221_v20  ;;  %v240_v28 = vrot.slane %v239_v24, 2 }
  0xfd   :  { %v260_v32 = vrot.slane %v259_v25, 2 }
  0xfe   :  { %381 = vlog2.f32 %v223_v27  ;;  %v241_v33 = vadd.f32 %v240_v28, %v239_v24 }
  0xff   :  { %v261_v34 = vadd.f32 %v260_v32, %v259_v25 }
 0x100   :  { %v242_v36 = vrot.slane %v241_v33, 1 }
 0x101   :  { %v262_v37 = vrot.slane %v261_v34, 1 }
 0x102   :  { %v243_v38 = vadd.f32 %v242_v36, %v241_v33 }
 0x103   :  { %v263_v39 = vadd.f32 %v262_v37, %v261_v34 }
 0x104   :  { %383 = vlog2.f32 %v243_v38 }
 0x105   :  { %385 = vlog2.f32 %v263_v39 }
 0x10b   :  { %v382_v47 = vpop.eup %381 }
 0x10c   :  { %v225_v52 = vmul.f32 0.6931472, %v382_v47 }
 0x10e   :  { %v226_v55 = vadd.f32 %v225_v52, %v473_v42 }
 0x110   :  { %v227_v60 = vsel %vm124_vm3, %v226_v55, 0.0  ;;  %vm550_vm3 = vcmask 130048  }
 0x111   :  { %v384_v54 = vpop.eup %383 }
 0x112   :  { %v386_v56 = vpop.eup %385  ;;  %v245_v57 = vmul.f32 0.6931472, %v384_v54 }
 0x113   :  { %v265_v58 = vmul.f32 0.6931472, %v386_v56 }
 0x114   :  { %v246_v59 = vadd.f32 %v245_v57, %v478_v46 }
 0x115   :  { %v266_v42 = vadd.f32 %v265_v58, %v484_v51 }
 0x116   :  { %v247_v61 = vsel %vm149_vm4, %v246_v59, %v227_v60  ;;  %v248_v62 = vsel %vm153_vm5, %v246_v59, 0.0  ;;  %vm551_vm4 = vmmov %vm550_vm3  ;;  %vm552_vm5 = vcmask 128000  }
 0x117   :  { %v268_v63 = vsel %vm176_vm7, %v266_v42, %v248_v62  ;;  %v269_v46 = vsel %vm180_vm8, %v266_v42, 0.0  ;;  %v270_v0 = vsub.f32 %v445_v13, %v247_v61  ;;  %vm324_vm7 = vcmask 122880  }
 0x118   :  { %v271_v1 = vsub.f32 %v447_v14, %v268_v63  ;;  %v272_v51 = vsub.f32 %v466_v26, %v269_v46 }
 0x119   :  { %v310_v2 = vsel %vm307_vm6, %v270_v0, 0.0 }
 0x11a   :  { %v311_v10 = vsel %vm308_vm14, %v271_v1, 0.0  ;;  %v312_v3 = vsel %vm309_vm15, %v272_v51, 0.0  ;;  %v313_v4 = vsel %vm550_vm3, %v310_v2, 0.0 }
 0x11b   :  { %v314_v5 = vsel %vm551_vm4, %v311_v10, 0.0  ;;  %v316_v11 = vsel %vm552_vm5, %v312_v3, 0.0 }
 0x11c   :  { %v315_v6 = vadd.f32 %v314_v5, %v313_v4 }
 0x11e   :  { %v317_v7 = vadd.f32 %v316_v11, %v315_v6 }
 0x120   :  { %v318_v12 = vrot.slane %v317_v7, 4 }
 0x122   :  { %v319_v8 = vadd.f32 %v318_v12, %v317_v7 }
 0x124   :  { %v320_v9 = vrot.slane %v319_v8, 2 }
 0x126   :  { %v321_v13 = vadd.f32 %v320_v9, %v319_v8 }
 0x128   :  { %v322_v15 = vrot.slane %v321_v13, 1 }
 0x12a   :  { %v323_v14 = vadd.f32 %v322_v15, %v321_v13 }
 0x12c   :  { %325 = vst.msk [vmem:[%s547_s3] sm:$0x1] %vm324_vm7, %v323_v14 }

</bundles_post_ra>
